<compile_context>
chip_gen: v5e
topology: v5e:2x2
jax: 0.10.0
libtpu: 0.0.40
codegen_flags: <defaults>
</compile_context>

<pallas_src>
import functools

import jax
import jax.numpy as jnp
from jax.experimental import pallas as pl
from jax.experimental.pallas import tpu as pltpu


# ---------------------------------------------------------------------------
# Pallas kernel: one (batch-tile, time-tile) block per grid step.
# ---------------------------------------------------------------------------
def pitch2vec_kernel(x_ref, w1_ref, b1_ref, w2_ref, b2_ref, o_ref, *,
                     bb, compute_dtype):
    f32 = jnp.float32

    # Hoist resident weight loads out of the (small, static) batch loop.
    w1 = w1_ref[...].astype(compute_dtype)          # (C, 1)
    b1 = b1_ref[...].astype(compute_dtype)          # (C, 1)
    w2 = w2_ref[...]                                 # (C, C)
    b2 = b2_ref[...].astype(f32)                     # (C, 1)

    for b in range(bb):                              # bb is small & static -> unrolled
        x = x_ref[b].astype(compute_dtype)           # (1, Tt)

        # c1: Conv1d(1, C, kernel=1) is a broadcast multiply + bias (VPU).
        # sin lowers to a VPU range-reduction + polynomial; compute_dtype=bf16
        # doubles its throughput on v6e/v7x if that slot ever binds.
        h = jnp.sin(w1 * x + b1)                     # (C, Tt)

        # c2: Conv1d(C, C, kernel=1) -> single pointwise channel matmul (MXU).
        y = jnp.dot(w2, h.astype(w2.dtype), preferred_element_type=f32) + b2

        o_ref[b] = y.astype(o_ref.dtype)


# ---------------------------------------------------------------------------
# Tiling plan: lane-dense time tiles, padded T, batch blocking, VMEM guard.
# ---------------------------------------------------------------------------
def _round_up(n, m):
    return ((n + m - 1) // m) * m


def _plan_time_tiles(B, C, T, time_tile, out_itemsize, *,
                     min_blocks=2, vmem_budget=8 << 20):
    T128 = _round_up(T, 128)
    tt = min(_round_up(max(time_tile, 128), 128), T128)

    # VMEM guard (v7x: 64 MiB physical / 32 MiB scoped default): the
    # double-buffered x + out blocks for a single batch row must stay small.
    while 2 * (tt * 4 + C * tt * out_itemsize) > vmem_budget and tt > 128:
        tt = max(128, _round_up(tt // 2, 128))

    # Keep at least `min_blocks` grid blocks so both v7x TensorCores get work.
    while B * pl.cdiv(T128, tt) < min_blocks and tt > 128:
        tt = max(128, _round_up(tt // 2, 128))

    nt = pl.cdiv(T128, tt)
    return tt, nt, nt * tt


def _pick_batch_tile(B, nt, per_batch_bytes, *,
                     target_bytes=256 << 10, min_blocks=2):
    divs = [d for d in range(1, B + 1) if B % d == 0]
    want = max(1, target_bytes // max(per_batch_bytes, 1))
    bb = max(d for d in divs if d <= want)           # divisor of B, <= want (1 always ok)
    while bb > 1 and (B // bb) * nt < min_blocks:    # don't starve a TensorCore
        bb = max(d for d in divs if d < bb)
    return bb


# ---------------------------------------------------------------------------
# Wrapper.
# ---------------------------------------------------------------------------
def pitch2vec_forward(x, params, *, time_tile=8192, batch_tile=None,
                      out_dtype=None, compute_dtype=jnp.float32):
    B, one, T = x.shape
    assert one == 1, "Pitch2Vec expects a single input channel"
    C = params["c1_w"].shape[0]

    out_dtype = x.dtype if out_dtype is None else out_dtype
    out_isz = jnp.dtype(out_dtype).itemsize

    tt, nt, T_pad = _plan_time_tiles(B, C, T, time_tile, out_isz)
    if batch_tile is None:
        bb = _pick_batch_tile(B, nt, C * tt * out_isz)
    else:
        bb = batch_tile
    assert B % bb == 0, "batch_tile must divide the batch size"
    nb = B // bb

    # Pad time up to the lane-dense tile so every store is an unmasked vst;
    # the padded tail is sliced off below (pointwise ops, so no contamination).
    if T_pad != T:
        x = jnp.pad(x, ((0, 0), (0, 0), (0, T_pad - T)))

    w1 = params["c1_w"].reshape(C, 1)                # (C, 1, 1) -> (C, 1)
    b1 = params["c1_b"].reshape(C, 1)
    w2 = params["c2_w"].reshape(C, C)                # (C, C, 1) -> (C, C)
    b2 = params["c2_b"].reshape(C, 1)

    weight_args = [w1, b1, w2, b2]
    # Constant index_map -> weight blocks stay resident in VMEM across the grid.
    weight_specs = [pl.BlockSpec(w.shape, lambda b, t: (0, 0)) for w in weight_args]

    grid_spec = pltpu.PrefetchScalarGridSpec(
        num_scalar_prefetch=0,
        grid=(nb, nt),
        in_specs=[pl.BlockSpec((bb, 1, tt), lambda b, t: (b, 0, t))] + weight_specs,
        out_specs=pl.BlockSpec((bb, C, tt), lambda b, t: (b, 0, t)),
    )

    # Advisory cost: c1 mul+add, c2 matmul (+bias), one sin per output element.
    flops = B * T_pad * (2 * C + 2 * C * C)
    transcendentals = B * C * T_pad
    bytes_accessed = 4 * B * T_pad + out_isz * B * C * T_pad + 4 * C * (3 + C)

    kernel = functools.partial(pitch2vec_kernel, bb=bb, compute_dtype=compute_dtype)

    out = pl.pallas_call(
        kernel,
        out_shape=jax.ShapeDtypeStruct((B, C, T_pad), out_dtype),
        grid_spec=grid_spec,
        compiler_params=pltpu.CompilerParams(
            dimension_semantics=("parallel", "parallel")),
        cost_estimate=pl.CostEstimate(
            flops=flops,
            transcendentals=transcendentals,
            bytes_accessed=bytes_accessed),
    )(x, *weight_args)

    return out[..., :T] if T_pad != T else out


# ---------------------------------------------------------------------------
# Pure-JAX reference (independent ops) for correctness check.
# ---------------------------------------------------------------------------
def pitch2vec_ref(x, p):
    h = jnp.einsum("oi,bit->bot", p["c1_w"][:, :, 0], x) + p["c1_b"][None, :, None]
    h = jnp.sin(h)
    y = jnp.einsum("oi,bit->bot", p["c2_w"][:, :, 0], h) + p["c2_b"][None, :, None]
    return y


if __name__ == "__main__":
    B, C, T = 2, 8, 256   # cond_channels = 8; T multiple of 128 for lane-dense tiles

    key = jax.random.PRNGKey(0)
    ks = jax.random.split(key, 5)

    params = {
        # matches torch.nn.init.normal_(self.c1.weight, mean=0.0, std=30.0)
        "c1_w": 30.0 * jax.random.normal(ks[0], (C, 1, 1), dtype=jnp.float32),
        "c1_b": 0.1 * jax.random.normal(ks[1], (C,), dtype=jnp.float32),
        "c2_w": 0.3 * jax.random.normal(ks[2], (C, C, 1), dtype=jnp.float32),
        "c2_b": 0.1 * jax.random.normal(ks[3], (C,), dtype=jnp.float32),
    }
    x = 0.1 * jax.random.normal(ks[4], (B, 1, T), dtype=jnp.float32)

    # Standard lane-aligned case.
    out = jax.block_until_ready(pitch2vec_forward(x, params))
    ref = jax.block_until_ready(pitch2vec_ref(x, params))
    assert out.shape == (B, C, T), out.shape
    err = float(jnp.max(jnp.abs(out - ref)))
    assert jnp.allclose(out, ref, atol=1e-3, rtol=1e-3), f"max abs err = {err}"

    # Ragged-T case: wrapper pads to a lane-dense multiple of 128 and slices back.
    Tr = 200
    x2 = x[..., :Tr]
    out2 = jax.block_until_ready(pitch2vec_forward(x2, params))
    ref2 = pitch2vec_ref(x2, params)
    assert out2.shape == (B, C, Tr), out2.shape
    err2 = float(jnp.max(jnp.abs(out2 - ref2)))
    assert jnp.allclose(out2, ref2, atol=1e-3, rtol=1e-3), f"max abs err = {err2}"

    print("KERNEL_OK")
</pallas_src>

<mosaic_0001>
module attributes {stable_mosaic.version = 11 : i64} {
  func.func @pitch2vec_kernel(%arg0: i32, %arg1: i32, %arg2: memref<1x1x256xf32, #tpu.memory_space<vmem>>, %arg3: memref<8x1xf32, #tpu.memory_space<vmem>>, %arg4: memref<8x1xf32, #tpu.memory_space<vmem>>, %arg5: memref<8x8xf32, #tpu.memory_space<vmem>>, %arg6: memref<8x1xf32, #tpu.memory_space<vmem>>, %arg7: memref<1x8x256xf32, #tpu.memory_space<vmem>>) attributes {dimension_semantics = [#tpu.dimension_semantics<parallel>, #tpu.dimension_semantics<parallel>], iteration_bounds = array<i64: 2, 1>, scalar_prefetch = 0 : i64, scratch_operands = 0 : i64, tpu.core_type = #tpu.core_type<tc>, window_params = [{transform_indices = @transform_0, window_bounds = array<i64: 1, 1, 256>}, {pipeline_mode = #tpu.pipeline_mode<synchronous>, transform_indices = @transform_1, window_bounds = array<i64: 8, 1>}, {pipeline_mode = #tpu.pipeline_mode<synchronous>, transform_indices = @transform_2, window_bounds = array<i64: 8, 1>}, {pipeline_mode = #tpu.pipeline_mode<synchronous>, transform_indices = @transform_3, window_bounds = array<i64: 8, 8>}, {pipeline_mode = #tpu.pipeline_mode<synchronous>, transform_indices = @transform_4, window_bounds = array<i64: 8, 1>}, {transform_indices = @transform_5, window_bounds = array<i64: 1, 8, 256>}]} {
    %c0 = arith.constant 0 : index
    %c0_0 = arith.constant 0 : index
    %0 = vector.load %arg3[%c0, %c0_0] : memref<8x1xf32, #tpu.memory_space<vmem>>, vector<8x1xf32>
    %c0_1 = arith.constant 0 : index
    %c0_2 = arith.constant 0 : index
    %1 = vector.load %arg4[%c0_1, %c0_2] : memref<8x1xf32, #tpu.memory_space<vmem>>, vector<8x1xf32>
    %c0_3 = arith.constant 0 : index
    %c0_4 = arith.constant 0 : index
    %2 = vector.load %arg5[%c0_3, %c0_4] : memref<8x8xf32, #tpu.memory_space<vmem>>, vector<8x8xf32>
    %c0_5 = arith.constant 0 : index
    %c0_6 = arith.constant 0 : index
    %3 = vector.load %arg6[%c0_5, %c0_6] : memref<8x1xf32, #tpu.memory_space<vmem>>, vector<8x1xf32>
    %c0_7 = arith.constant 0 : index
    %c0_8 = arith.constant 0 : index
    %c0_9 = arith.constant 0 : index
    %4 = vector.load %arg2[%c0_7, %c0_8, %c0_9] : memref<1x1x256xf32, #tpu.memory_space<vmem>>, vector<1x1x256xf32>
    %5 = vector.shape_cast %4 : vector<1x1x256xf32> to vector<1x256xf32>
    %6 = vector.broadcast %0 : vector<8x1xf32> to vector<8x256xf32>
    %7 = vector.broadcast %5 : vector<1x256xf32> to vector<8x256xf32>
    %8 = arith.mulf %6, %7 : vector<8x256xf32>
    %9 = vector.broadcast %1 : vector<8x1xf32> to vector<8x256xf32>
    %10 = arith.addf %8, %9 : vector<8x256xf32>
    %11 = math.sin %10 : vector<8x256xf32>
    %cst = arith.constant dense<0.000000e+00> : vector<8x256xf32>
    %12 = tpu.matmul %2, %11, %cst {dimension_numbers = #tpu.dot_dimension_numbers<[1], [0], [0], [1], [0, 0, 1, 1], [], []>} : vector<8x8xf32>, vector<8x256xf32>, vector<8x256xf32> -> vector<8x256xf32>
    %13 = vector.broadcast %3 : vector<8x1xf32> to vector<8x256xf32>
    %14 = arith.addf %12, %13 : vector<8x256xf32>
    %c0_10 = arith.constant 0 : index
    %c0_11 = arith.constant 0 : index
    %c0_12 = arith.constant 0 : index
    %15 = vector.load %arg7[%c0_10, %c0_11, %c0_12] : memref<1x8x256xf32, #tpu.memory_space<vmem>>, vector<1x8x256xf32>
    %16 = vector.shape_cast %15 : vector<1x8x256xf32> to vector<8x256xf32>
    %17 = vector.shape_cast %14 : vector<8x256xf32> to vector<1x8x256xf32>
    tpu.vector_store %arg7[%c0_10, %c0_11, %c0_12], %17 {strides = array<i32>} : memref<1x8x256xf32, #tpu.memory_space<vmem>>, vector<1x8x256xf32>,
    return
  }
  func.func @transform_0(%arg0: i32, %arg1: i32) -> (i32, i32, i32) {
    %c0_i32 = arith.constant 0 : i32
    %c0_i32_0 = arith.constant 0 : i32
    return %arg0, %c0_i32, %arg1 : i32, i32, i32
  }
  func.func @transform_1(%arg0: i32, %arg1: i32) -> (i32, i32) {
    %c0_i32 = arith.constant 0 : i32
    %c0_i32_0 = arith.constant 0 : i32
    %c0_i32_1 = arith.constant 0 : i32
    return %c0_i32, %c0_i32_0 : i32, i32
  }
  func.func @transform_2(%arg0: i32, %arg1: i32) -> (i32, i32) {
    %c0_i32 = arith.constant 0 : i32
    %c0_i32_0 = arith.constant 0 : i32
    %c0_i32_1 = arith.constant 0 : i32
    return %c0_i32, %c0_i32_0 : i32, i32
  }
  func.func @transform_3(%arg0: i32, %arg1: i32) -> (i32, i32) {
    %c0_i32 = arith.constant 0 : i32
    %c0_i32_0 = arith.constant 0 : i32
    %c0_i32_1 = arith.constant 0 : i32
    return %c0_i32, %c0_i32_0 : i32, i32
  }
  func.func @transform_4(%arg0: i32, %arg1: i32) -> (i32, i32) {
    %c0_i32 = arith.constant 0 : i32
    %c0_i32_0 = arith.constant 0 : i32
    %c0_i32_1 = arith.constant 0 : i32
    return %c0_i32, %c0_i32_0 : i32, i32
  }
  func.func @transform_5(%arg0: i32, %arg1: i32) -> (i32, i32, i32) {
    %c0_i32 = arith.constant 0 : i32
    %c0_i32_0 = arith.constant 0 : i32
    return %arg0, %c0_i32, %arg1 : i32, i32, i32
  }
}

</mosaic_0001>

<bundles_post_ra>
// kernel: tpu_custom_call.1
= control target key start
LH: loop header
LB: loop body
LE: loop exit
PB: predicated region body
PF: predicated region fallthrough
CT: control target
= control target key end

     0   :  { %10 = vsyncpa [#allocation3], 0  ;;  %s1222_s0 = inlined_call_operand.vmem [shape: f32[2,1,256], index: 0, kind: input, shape index: {}]   ;;  %s1223_s1 = inlined_call_operand.vmem [shape: f32[8,1], index: 1, kind: input, shape index: {}]   ;;  %s1224_s2 = inlined_call_operand.vmem [shape: f32[8,1], index: 2, kind: input, shape index: {}]   ;;  %s1225_s3 = inlined_call_operand.vmem [shape: f32[8,8], index: 3, kind: input, shape index: {}]   ;;  %s1226_s4 = inlined_call_operand.vmem [shape: f32[8,1], index: 4, kind: input, shape index: {}]   ;;  %s1227_s5 = inlined_call_operand.hbm [shape: f32[2,8,256], index: 5, kind: output, shape index: {}]  }
   0x1   :  { %12 = vsyncpa [#allocation3 + $0x1], 0  ;;  %s930_s18 = smov 0   ;;  %s932_s19 = smov 0  }
   0x2   :  { %s934_s20 = smov 0   ;;  %s936_s21 = smov 0  }
   0x3   :  { %s938_s22 = smov 0   ;;  %s940_s23 = smov 0  }
   0x4 LB: > { %s728_s24 = sadd.s32 4294967295, %s891_s23   ;;  %s729_s25 = sadd.s32 4294967294, %s891_s23   ;;  %s891_s23 = sphi %s940_s23, %s18_s23   ;;  %s887_s22 = sphi %s938_s22, %s1238_s22   ;;  %s883_s21 = sphi %s936_s21, %s1237_s21   ;;  %s879_s20 = sphi %s934_s20, %s1236_s20   ;;  %s875_s19 = sphi %s932_s19, %s1235_s19   ;;  %s871_s18 = sphi %s930_s18, %s1234_s18  }
   0x5   : > { %s30_s26 = sadd.s32 1, %s887_s22  ;;  %s151_s27 = sadd.s32 1, %s879_s20 }
   0x6   : > { %p32_p0 = scmp.ge.s32.totalorder %s30_s26, 2  ;;  %p161_p1 = scmp.ne.s32.totalorder %s879_s20, %s875_s19 }
   0x7   : > { %p162_p2 = scmp.eq.s32.totalorder %s728_s24, 1  ;;  %p167_p3 = scmp.ne.s32.totalorder %s875_s19, %s871_s18 }
   0x8   : > { %s1240_s26 = smov (%p32_p0, %s30_s26), 0  ;;  %p168_p5 = scmp.eq.s32.totalorder %s729_s25, 1 }
   0x9   : > { %p970_p4 = por %p162_p2, %p161_p1  ;;  %s146_s29 = ssub.s32 %s887_s22, %s1240_s26 }
   0xa   : > { %p732_p6 = scmp.ge.s32.totalorder %s891_s23, 1  ;;  %p149_p7 = scmp.eq.s32.totalorder %s146_s29, 0 }
   0xb   : > { %p977_p8 = por %p168_p5, %p167_p3  ;;  %p210_p9 = scmp.lt.s32.totalorder %s891_s23, 3 }
   0xc   : > { %s983_s6 = scalar_select %p149_p7, %s879_s20, %s151_s27  }
   0xd   : > { %p211_p10 = pnand %p732_p6, %p210_p9 }
   0xe   : > { %p242_p11 = scmp.lt.s32.totalorder (!%p211_p10), %s883_s21, 1  ;;  %s238_s27 = sand.u32 (!%p211_p10), 1, %s875_s19  }
   0xf   : > { %214 = sbr.rel (%p211_p10) target bundleno = 392 (0x188), region = 40  ;;  %s733_s29 = sshll.u32 (!%p211_p10), %s238_s27, 4 }
  0x10   : > { %s240_s7 = scalar_lea.vmem (!%p211_p10), [#allocation2], %s733_s29  ;;  %s748_s8 = sshll.u32 (!%p211_p10), %s883_s21, 4 }
  0x11   : > { %s637_s14 = scalar_lea.sflag (!%p211_p10), [#allocation3], %s238_s27  ;;  %s833_s24 = scalar_lea.hbm (!%p211_p10), %s1227_s5, 32 }
  0x14   : > { %v251_v0 = vld [vmem:[%s1223_s1] sm:$0xff]  ;;  %v893_v1 = vmov 0   ;;  %s243_s11 = scalar_select %p242_p11, %s883_s21, 1  ;;  %v894_v33 = vmov 2102212464  }
  0x15   : > { %811 = vset.pattern.permute.xlu0 %v893_v1  ;;  %812 = vset.pattern.permute.xlu1 %v893_v1  ;;  %v252_v2 = vld [vmem:[%s1224_s2] sm:$0xff]  ;;  %v895_v38 = vmov 920167782   ;;  %v896_v41 = vmov 1326507024  }
  0x16   : > { %258 = vperm.xlu0 %811, %v251_v0   ;;  %s734_s12 = sshll.u32 %s243_s11, 1  ;;  %v897_v45 = vmov 683565275   ;;  %v898_v47 = vmov 2475754826   ;;  %s650_s11 = scalar_lea.hbm %s1227_s5, %s748_s8 }
  0x17   : > { %s248_s15 = scalar_lea.vmem %s1222_s0, %s734_s12  ;;  %v899_v52 = vmov 2131351028   ;;  %s652_s12 = sshll.u32 %s240_s7, 4  ;;  %s653_s12 = int_to_ptr.vmem [resolvable:$true] %s652_s12 }
  0x18   : > { %v255_v4 = vld [vmem:[%s248_s15] sm:$0x3]  ;;  %s654_s13 = sshll.u32 %s650_s11, 4  ;;  %s655_s13 = int_to_ptr.hbm [resolvable:$true] %s654_s13 }
  0x19   : > { %v262_v5 = vperm.slane %v255_v4, 0  ;;  %v263_v6 = vperm.slane %v255_v4, 1  ;;  %s827_s15 = sshra.s32 %s655_s13, 4  ;;  %s828_s15 = int_to_ptr.hbm [resolvable:$true] %s827_s15 }
  0x1a   : > { %s829_s16 = scalar_lea.hbm %s828_s15, 16  ;;  %p834_p1 = scmp.lt.s32.totalorder %s828_s15, %s1227_s5 }
  0x1b   : > { %p830_p12 = scmp.ne.s32.totalorder %s828_s15, %s829_s16  ;;  %p835_p2 = scmp.lt.s32.totalorder %s833_s24, %s829_s16 }
  0x1d   : > { %p831_p13 = pnand %p830_p12, %p970_p4  ;;  %p836_p3 = por %p835_p2, %p834_p1 }
  0x1e   : > { %270 = vperm.xlu0 %811, %v252_v2  }
  0x1f   : > { %p832_p0 = pneg %p831_p13 }
  0x21   : > { %p837_p5 = pnand %p836_p3, %p832_p0 }
  0x88   : > { %v259_v3 = vpop.permute.xlu0 %258 }
  0x89   : > { %v266_v7 = vmul.f32 %v262_v5, %v259_v3  ;;  %v267_v8 = vmul.f32 %v263_v6, %v259_v3 }
  0x90   : > { %v271_v9 = vpop.permute.xlu0 %270 }
  0x91   : > { %v998_v10 = vadd.f32 %v271_v9, %v266_v7  ;;  %v1000_v11 = vadd.f32 %v271_v9, %v267_v8 }
  0x93   : > { %v278_v12 = vand.u32 2139095040, %v998_v10  ;;  %v433_v13 = vand.u32 2139095040, %v1000_v11  ;;  %v275_v14 = vand.u32 2147483647, %v998_v10  ;;  %v430_v15 = vand.u32 2147483647, %v1000_v11 }
  0x95   : > { %v279_v16 = vshrl.u32 %v278_v12, 23  ;;  %v434_v17 = vshrl.u32 %v433_v13, 23  ;;  %v282_v18 = vand.u32 8388607, %v275_v14  ;;  %v437_v22 = vand.u32 8388607, %v430_v15 }
  0x97   : > { %v735_v19 = vadd.s32 4294967169, %v279_v16  ;;  %v738_v20 = vadd.s32 4294967169, %v434_v17  ;;  %v283_v21 = vor.u32 8388608, %v282_v18  ;;  %v438_v28 = vor.u32 8388608, %v437_v22 }
  0x99   : > { %v285_v23 = vadd.s32 1, %v735_v19  ;;  %v440_v24 = vadd.s32 1, %v738_v20  ;;  %v1010_v27 = vshll.u32 %v283_v21, 8  ;;  %v1021_v37 = vshll.u32 %v438_v28, 8 }
  0x9b   : > { %vm286_vm0 = vcmp.gt.s32.totalorder %v285_v23, 0  ;;  %vm441_vm1 = vcmp.gt.s32.totalorder %v440_v24, 0  ;;  %v324_v36 = vand.u32 65535, %v1010_v27  ;;  %v325_v0 = vshrl.u32 %v1010_v27, 16 }
  0x9c   : > { %v287_v25 = vsel %vm286_vm0, %v285_v23, 0  ;;  %v442_v26 = vsel %vm441_vm1, %v440_v24, 0 }
  0x9d   : > { %v1012_v29 = vshrl.u32 %v287_v25, 5  ;;  %v289_v30 = vand.u32 31, %v287_v25  ;;  %v1014_v31 = vand.u32 31, %v442_v26  ;;  %v1037_v62 = vshrl.u32 %v442_v26, 5 }
  0x9f   : > { %v290_v32 = vsub.s32 32, %v289_v30  ;;  %v301_v34 = vshll.u32 %v894_v33, %v289_v30  ;;  %v1018_v35 = vsub.s32 32, %v1014_v31  ;;  %v304_v40 = vshll.u32 %v895_v38, %v289_v30 }
  0xa0   : > { %vm310_vm2 = vcmp.lt.s32.totalorder %v1012_v29, 4  ;;  %v292_v46 = vshll.u32 %v897_v45, %v289_v30  ;;  %v295_v51 = vshll.u32 %v898_v47, %v289_v30  ;;  %v456_v54 = vshll.u32 %v894_v33, %v1014_v31 }
  0xa1   : > { %v302_v39 = vshrl.u32 %v895_v38, %v290_v32  ;;  %v305_v42 = vshrl.u32 %v896_v41, %v290_v32  ;;  %v457_v43 = vshrl.u32 %v895_v38, %v1018_v35  ;;  %v460_v44 = vshrl.u32 %v896_v41, %v1018_v35 }
  0xa2   : > { %v293_v48 = vshrl.u32 %v898_v47, %v290_v32  ;;  %v296_v53 = vshrl.u32 %v899_v52, %v290_v32  ;;  %v298_v56 = vshll.u32 %v899_v52, %v289_v30  ;;  %v299_v57 = vshrl.u32 %v894_v33, %v290_v32 }
  0xa3   : > { %v303_v49 = vor.u32 %v302_v39, %v301_v34  ;;  %v306_v50 = vor.u32 %v305_v42, %v304_v40  ;;  %v459_v60 = vshll.u32 %v895_v38, %v1014_v31  ;;  %vm307_vm3 = vcmp.lt.s32.totalorder %v1012_v29, 1 }
  0xa4   : > { %v294_v55 = vor.u32 %v293_v48, %v292_v46  ;;  %v297_v61 = vor.u32 %v296_v53, %v295_v51  ;;  %v300_v63 = vor.u32 %v299_v57, %v298_v56  ;;  %v1041_v2 = vor.u32 %v457_v43, %v456_v54 }
  0xa5   : > { %v316_v58 = vsel %vm310_vm2, %v303_v49, 920167782  ;;  %v320_v59 = vsel %vm310_vm2, %v306_v50, 1326507024  ;;  %v461_v3 = vor.u32 %v460_v44, %v459_v60  ;;  %vm309_vm4 = vcmp.lt.s32.totalorder %v1012_v29, 3 }
  0xa6   : > { %v315_v4 = vsel %vm307_vm3, %v294_v55, %v297_v61  ;;  %vm308_vm5 = vcmp.lt.s32.totalorder %v1012_v29, 2  ;;  %v317_v5 = vsel %vm309_vm4, %v300_v63, %v316_v58  ;;  %v319_v6 = vsel %vm307_vm3, %v297_v61, %v300_v63 }
  0xa7   : > { %v321_v7 = vsel %vm309_vm4, %v303_v49, %v320_v59  ;;  %v291_v8 = vshrl.u32 %v897_v45, %v290_v32  ;;  %v312_v9 = vsel %vm310_vm2, %v300_v63, 2102212464  ;;  %v318_v12 = vsel %vm308_vm5, %v315_v4, %v317_v5 }
  0xa8   : > { %v322_v13 = vsel %vm308_vm5, %v319_v6, %v321_v7  ;;  %vm465_vm6 = vcmp.lt.s32.totalorder %v1037_v62, 4  ;;  %v348_v18 = vand.u32 65535, %v318_v12  ;;  %v349_v22 = vshrl.u32 %v318_v12, 16 }
  0xa9   : > { %v326_v16 = vand.u32 65535, %v322_v13  ;;  %v327_v17 = vshrl.u32 %v322_v13, 16  ;;  %v471_v19 = vsel %vm465_vm6, %v1041_v2, 920167782  ;;  %v475_v20 = vsel %vm465_vm6, %v461_v3, 1326507024 }
  0xaa   : > { %v311_v21 = vsel %vm307_vm3, %v291_v8, %v294_v55  ;;  %v313_v23 = vsel %vm309_vm4, %v297_v61, %v312_v9  ;;  %v447_v26 = vshll.u32 %v897_v45, %v1014_v31  ;;  %v351_v28 = vmul.u32 %v349_v22, %v324_v36 }
  0xab   : > { %v329_v24 = vmul.u32 %v327_v17, %v324_v36  ;;  %v330_v25 = vmul.u32 %v326_v16, %v325_v0  ;;  %v352_v30 = vmul.u32 %v348_v18, %v325_v0  ;;  %v448_v32 = vshrl.u32 %v898_v47, %v1018_v35 }
  0xac   : > { %v450_v34 = vshll.u32 %v898_v47, %v1014_v31  ;;  %v328_v38 = vmul.u32 %v326_v16, %v324_v36  ;;  %v331_v39 = vmul.u32 %v327_v17, %v325_v0  ;;  %v350_v41 = vmul.u32 %v348_v18, %v324_v36 }
  0xad   : > { %v332_v40 = vshll.u32 %v329_v24, 16  ;;  %v333_v42 = vshrl.u32 %v329_v24, 16  ;;  %v334_v43 = vshll.u32 %v330_v25, 16  ;;  %v353_v44 = vmul.u32 %v349_v22, %v325_v0 }
  0xae   : > { %v354_v46 = vshll.u32 %v351_v28, 16  ;;  %v356_v49 = vshll.u32 %v352_v30, 16  ;;  %v451_v50 = vshrl.u32 %v899_v52, %v1018_v35  ;;  %v1077_v54 = vor.u32 %v448_v32, %v447_v26 }
  0xaf   : > { %vm336_vm7 = vc.u32 %v328_v38, %v332_v40  ;;  %v338_v48 = vadd.s32 %v332_v40, %v328_v38  ;;  %v335_v56 = vshrl.u32 %v330_v25, 16  ;;  %v453_v61 = vshll.u32 %v899_v52, %v1014_v31 }
  0xb0   : > { %v337_v51 = vsel %vm336_vm7, 1, %v893_v1  ;;  %vm358_vm8 = vc.u32 %v350_v41, %v354_v46  ;;  %v360_v53 = vadd.s32 %v354_v46, %v350_v41  ;;  %v1080_v55 = vor.u32 %v451_v50, %v450_v34 }
  0xb1   : > { %v339_v47 = vadd.s32 %v337_v51, %v331_v39  ;;  %vm340_vm9 = vc.u32 %v338_v48, %v334_v43  ;;  %v359_v36 = vsel %vm358_vm8, 1, %v893_v1  ;;  %v454_v63 = vshrl.u32 %v894_v33, %v1018_v35 }
  0xb2   : > { %v341_v57 = vsel %vm340_vm9, 1, %v893_v1  ;;  %v361_v58 = vadd.s32 %v359_v36, %v353_v44  ;;  %vm362_vm10 = vc.u32 %v360_v53, %v356_v49  ;;  %v355_v0 = vshrl.u32 %v351_v28, 16 }
  0xb3   : > { %v343_v59 = vadd.s32 %v341_v57, %v339_v47  ;;  %v363_v60 = vsel %vm362_vm10, 1, %v893_v1  ;;  %vm462_vm11 = vcmp.lt.s32.totalorder %v1037_v62, 1  ;;  %vm464_vm12 = vcmp.lt.s32.totalorder %v1037_v62, 3 }
  0xb4   : > { %v365_v3 = vadd.s32 %v363_v60, %v361_v58  ;;  %v455_v5 = vor.u32 %v454_v63, %v453_v61  ;;  %v470_v6 = vsel %vm462_vm11, %v1077_v54, %v1080_v55  ;;  %v476_v31 = vsel %vm464_vm12, %v1041_v2, %v475_v20 }
  0xb5   : > { %v344_v4 = vadd.s32 %v343_v59, %v333_v42  ;;  %v357_v52 = vshrl.u32 %v352_v30, 16  ;;  %v1097_v7 = vadd.s32 %v360_v53, %v356_v49  ;;  %vm463_vm13 = vcmp.lt.s32.totalorder %v1037_v62, 2 }
  0xb6   : > { %v366_v33 = vadd.s32 %v365_v3, %v355_v0  ;;  %v472_v9 = vsel %vm464_vm12, %v455_v5, %v471_v19  ;;  %v474_v12 = vsel %vm462_vm11, %v1080_v55, %v455_v5  ;;  %v314_v13 = vsel %vm308_vm5, %v311_v21, %v313_v23 }
  0xb7   : > { %v1099_v8 = vadd.s32 %v344_v4, %v335_v56  ;;  %v473_v2 = vsel %vm463_vm13, %v470_v6, %v472_v9  ;;  %v477_v17 = vsel %vm463_vm13, %v474_v12, %v476_v31  ;;  %v479_v18 = vand.u32 65535, %v1021_v37 }
  0xb8   : > { %v367_v16 = vadd.s32 %v366_v33, %v357_v52  ;;  %v480_v19 = vshrl.u32 %v1021_v37, 16  ;;  %v481_v20 = vand.u32 65535, %v477_v17  ;;  %v482_v24 = vshrl.u32 %v477_v17, 16 }
  0xb9   : > { %vm370_vm14 = vc.u32 %v1099_v8, %v1097_v7  ;;  %v503_v25 = vand.u32 65535, %v473_v2  ;;  %v504_v29 = vshrl.u32 %v473_v2, 16  ;;  %v368_v21 = vmul.u32 %v1010_v27, %v314_v13 }
  0xba   : > { %v371_v22 = vadd.s32 1, %v367_v16  ;;  %v484_v26 = vmul.u32 %v482_v24, %v479_v18  ;;  %v485_v28 = vmul.u32 %v481_v20, %v480_v19  ;;  %v483_v34 = vmul.u32 %v481_v20, %v479_v18 }
  0xbb   : > { %v506_v32 = vmul.u32 %v504_v29, %v479_v18  ;;  %v507_v39 = vmul.u32 %v503_v25, %v480_v19  ;;  %v486_v41 = vmul.u32 %v482_v24, %v480_v19  ;;  %v505_v42 = vmul.u32 %v503_v25, %v479_v18 }
  0xbc   : > { %v372_v23 = vsel %vm370_vm14, %v371_v22, %v367_v16  ;;  %v487_v38 = vshll.u32 %v484_v26, 16  ;;  %v489_v44 = vshll.u32 %v485_v28, 16  ;;  %v508_v48 = vmul.u32 %v504_v29, %v480_v19 }
  0xbd   : > { %v373_v30 = vadd.s32 %v372_v23, %v368_v21  ;;  %v509_v43 = vshll.u32 %v506_v32, 16  ;;  %v511_v53 = vshll.u32 %v507_v39, 16  ;;  %v467_v58 = vsel %vm465_vm6, %v455_v5, 2102212464 }
  0xbe   : > { %vm491_vm15 = vc.u32 %v483_v34, %v487_v38  ;;  %v493_v46 = vadd.s32 %v487_v38, %v483_v34  ;;  %v488_v59 = vshrl.u32 %v484_v26, 16  ;;  %v446_v63 = vshrl.u32 %v897_v45, %v1018_v35 }
  0xbf   : > { %v374_v40 = vadd.s32 536870912, %v373_v30  ;;  %v492_v27 = vsel %vm491_vm15, 1, %v893_v1  ;;  %vm513_vm0 = vc.u32 %v505_v42, %v509_v43  ;;  %v515_v50 = vadd.s32 %v509_v43, %v505_v42 }
  0xc0   : > { %v494_v51 = vadd.s32 %v492_v27, %v486_v41  ;;  %vm495_vm1 = vc.u32 %v493_v46, %v489_v44  ;;  %v514_v47 = vsel %vm513_vm0, 1, %v893_v1  ;;  %v490_v3 = vshrl.u32 %v485_v28, 16 }
  0xc1   : > { %v1118_v49 = vshrl.u32 %v374_v40, 30  ;;  %v496_v56 = vsel %vm495_vm1, 1, %v893_v1  ;;  %v516_v57 = vadd.s32 %v514_v47, %v508_v48  ;;  %vm517_vm2 = vc.u32 %v515_v50, %v511_v53 }
  0xc2   : > { %v498_v60 = vadd.s32 %v496_v56, %v494_v51  ;;  %v518_v0 = vsel %vm517_vm2, 1, %v893_v1  ;;  %v510_v6 = vshrl.u32 %v506_v32, 16  ;;  %v466_v33 = vsel %vm462_vm11, %v446_v63, %v1077_v54 }
  0xc3   : > { %v376_v36 = vshll.u32 %v1118_v49, 30  ;;  %v520_v31 = vadd.s32 %v518_v0, %v516_v57  ;;  %v468_v5 = vsel %vm464_vm12, %v1080_v55, %v467_v58  ;;  %v512_v12 = vshrl.u32 %v507_v39, 16 }
  0xc4   : > { %v499_v4 = vadd.s32 %v498_v60, %v488_v59  ;;  %v519_v45 = vadd.s32 %v515_v50, %v511_v53  ;;  %v469_v16 = vsel %vm463_vm13, %v466_v33, %v468_v5  ;;  %v369_v55 = vadd.s32 %v1097_v7, %v1099_v8 }
  0xc5   : > { %v377_v61 = vsub.s32 %v373_v30, %v376_v36  ;;  %v521_v13 = vadd.s32 %v520_v31, %v510_v6  ;;  %v523_v19 = vmul.u32 %v1021_v37, %v469_v16  ;;  %vm277_vm7 = vcmp.lt.s32.totalorder %v998_v10, 0 }
  0xc6   : > { %v500_v9 = vadd.s32 %v499_v4, %v490_v3  ;;  %vm1146_vm8 = vcmp.le.f32.partialorder %v275_v14, 0.7853982  ;;  %v399_v48 = vsub.s32 4, %v1118_v49  ;;  %vm1162_vm10 = vcmp.le.f32.partialorder %v430_v15, 0.7853982 }
  0xc7   : > { %vm378_vm3 = vcmp.lt.s32.totalorder %v377_v61, 0  ;;  %v379_v52 = vsub.s32 0, %v377_v61  ;;  %v522_v2 = vadd.s32 %v521_v13, %v512_v12  ;;  %vm432_vm11 = vcmp.lt.s32.totalorder %v1000_v11, 0 }
  0xc8   : > { %vm525_vm4 = vc.u32 %v500_v9, %v519_v45  ;;  %v524_v36 = vadd.s32 %v519_v45, %v500_v9  ;;  %v400_v14 = vsel %vm277_vm7, %v399_v48, %v1118_v49  ;;  %v254_v49 = vld [vmem:[%s1226_s4] sm:$0xff]  ;;  %vm418_vm15 = vweird.f32 %v998_v10 }
  0xc9   : > { %v380_v35 = vsel %vm378_vm3, %v379_v52, %v377_v61  ;;  %v526_v18 = vadd.s32 1, %v522_v2  ;;  %v402_v0 = vsel %vm1146_vm8, 0, %v400_v14  ;;  %587 = vperm.xlu1 %812, %v254_v49   ;;  %vm590_vm0 = vcmask 64512  }
  0xca   : > { %v381_v1 = vclz %v380_v35  ;;  %v419_v5 = vadd.s32 3, %v402_v0 }
  0xcb   : > { %v527_v54 = vsel %vm525_vm4, %v526_v18, %v522_v2  ;;  %vm573_vm4 = vweird.f32 %v1000_v11 }
  0xcc   : > { %v736_v17 = vadd.s32 4294967294, %v381_v1  ;;  %v528_v22 = vadd.s32 %v527_v54, %v523_v19  ;;  %v420_v2 = vand.u32 3, %v419_v5 }
  0xce   : > { %vm737_vm5 = vcmp.lt.s32.totalorder %v736_v17, 0  ;;  %v529_v29 = vadd.s32 536870912, %v528_v22  ;;  %vm421_vm12 = vcmp.lt.s32.totalorder %v420_v2, 2  ;;  %vm422_vm13 = vcmp.eq.s32.totalorder %v420_v2, 0 }
  0xcf   : > { %v384_v20 = vsel %vm737_vm5, 0, %v736_v17  ;;  %vm425_vm14 = vcmp.eq.s32.totalorder %v420_v2, 2 }
  0xd0   : > { %v385_v24 = vsub.s32 32, %v384_v20  ;;  %v389_v25 = vsub.s32 4294967266, %v384_v20  ;;  %v386_v21 = vshll.u32 %v377_v61, %v384_v20  ;;  %v1140_v26 = vshrl.u32 %v529_v29, 30 }
  0xd2   : > { %v387_v23 = vshrl.u32 %v369_v55, %v385_v24  ;;  %v390_v62 = vadd.s32 127, %v389_v25  ;;  %v531_v32 = vshll.u32 %v1140_v26, 30  ;;  %v554_v29 = vsub.s32 4, %v1140_v26 }
  0xd4   : > { %v388_v28 = vor.u32 %v387_v23, %v386_v21  ;;  %v391_v30 = vshll.u32 %v390_v62, 23  ;;  %v532_v34 = vsub.s32 %v528_v22, %v531_v32  ;;  %v253_v62 = vld [vmem:[%s1225_s3] sm:$0xff] }
  0xd6   : > { %v392_v37 = vor.u32 4788187, %v391_v30  ;;  %v395_v39 = vcvt.s32.f32 %v388_v28  ;;  %vm533_vm6 = vcmp.lt.s32.totalorder %v532_v34, 0  ;;  %v534_v40 = vsub.s32 0, %v532_v34 }
  0xd8   : > { %v393_v38 = vand.u32 2147483647, %v392_v37  ;;  %v535_v7 = vsel %vm533_vm6, %v534_v40, %v532_v34  ;;  %v555_v37 = vsel %vm432_vm11, %v554_v29, %v1140_v26 }
  0xd9   : > { %v536_v42 = vclz %v535_v7 }
  0xda   : > { %v396_v41 = vmul.f32 %v395_v39, %v393_v38 }
  0xdb   : > { %v739_v46 = vadd.s32 4294967294, %v536_v42 }
  0xdc   : > { %v397_v8 = vxor.u32 2147483648, %v396_v41 }
  0xdd   : > { %vm740_vm9 = vcmp.lt.s32.totalorder %v739_v46, 0 }
  0xde   : > { %v398_v44 = vsel %vm277_vm7, %v397_v8, %v396_v41  ;;  %v539_v51 = vsel %vm740_vm9, 0, %v739_v46 }
  0xdf   : > { %v401_v27 = vsel %vm1146_vm8, %v998_v10, %v398_v44  ;;  %v540_v56 = vsub.s32 32, %v539_v51  ;;  %v544_v57 = vsub.s32 4294967266, %v539_v51  ;;  %v541_v61 = vshll.u32 %v532_v34, %v539_v51 }
  0xe0   : > { %v403_v50 = vmul.f32 %v401_v27, %v401_v27  ;;  %v557_v10 = vsel %vm1162_vm10, 0, %v555_v37 }
  0xe1   : > { %v542_v60 = vshrl.u32 %v524_v36, %v540_v56  ;;  %v545_v63 = vadd.s32 127, %v544_v57  ;;  %v574_v8 = vadd.s32 3, %v557_v10 }
  0xe2   : > { %v404_v53 = vmul.f32 -0.001358992, %v403_v50  ;;  %v411_v47 = vmul.f32 -0.00019511016, %v403_v50 }
  0xe3   : > { %v543_v6 = vor.u32 %v542_v60, %v541_v61  ;;  %v546_v31 = vshll.u32 %v545_v63, 23  ;;  %v575_v48 = vand.u32 3, %v574_v8 }
  0xe4   : > { %v405_v58 = vadd.f32 0.041655596, %v404_v53  ;;  %v412_v59 = vadd.f32 0.008332121, %v411_v47 }
  0xe5   : > { %v547_v9 = vor.u32 4788187, %v546_v31  ;;  %v550_v45 = vcvt.s32.f32 %v543_v6  ;;  %vm577_vm1 = vcmp.eq.s32.totalorder %v575_v48, 0  ;;  %vm580_vm2 = vcmp.eq.s32.totalorder %v575_v48, 2 }
  0xe6   : > { %v406_v3 = vmul.f32 %v405_v58, %v403_v50  ;;  %v413_v4 = vmul.f32 %v412_v59, %v403_v50  ;;  %vm576_vm3 = vcmp.lt.s32.totalorder %v575_v48, 2 }
  0xe7   : > { %v548_v35 = vand.u32 2147483647, %v547_v9 }
  0xe8   : > { %v407_v52 = vadd.f32 -0.4999988, %v406_v3  ;;  %v414_v33 = vadd.f32 -0.16666654, %v413_v4 }
  0xe9   : > { %v551_v17 = vmul.f32 %v550_v45, %v548_v35 }
  0xea   : > { %v408_v12 = vmul.f32 %v407_v52, %v403_v50  ;;  %v415_v13 = vmul.f32 %v414_v33, %v403_v50 }
  0xeb   : > { %v552_v54 = vxor.u32 2147483648, %v551_v17 }
  0xec   : > { %v409_v1 = vadd.f32 1.0, %v408_v12  ;;  %v416_v16 = vadd.f32 1.0, %v415_v13 }
  0xed   : > { %v553_v55 = vsel %vm432_vm11, %v552_v54, %v551_v17 }
  0xee   : > { %v417_v18 = vmul.f32 %v416_v16, %v401_v27  ;;  %v426_v19 = vxor.u32 2147483648, %v409_v1  ;;  %v556_v21 = vsel %vm1162_vm10, %v1000_v11, %v553_v55 }
  0xef   : > { %v558_v23 = vmul.f32 %v556_v21, %v556_v21 }
  0xf0   : > { %v423_v20 = vxor.u32 2147483648, %v417_v18  ;;  %v427_v25 = vsel %vm425_vm14, %v426_v19, %v417_v18 }
  0xf1   : > { %v559_v30 = vmul.f32 -0.001358992, %v558_v23  ;;  %v566_v32 = vmul.f32 -0.00019511016, %v558_v23 }
  0xf2   : > { %v424_v24 = vsel %vm422_vm13, %v409_v1, %v423_v20 }
  0xf3   : > { %v428_v15 = vsel %vm421_vm12, %v424_v24, %v427_v25  ;;  %v560_v34 = vadd.f32 0.041655596, %v559_v30  ;;  %v567_v38 = vadd.f32 0.008332121, %v566_v32 }
  0xf4   : > { %v429_v28 = vsel %vm418_vm15, nan, %v428_v15 }
  0xf5   : > { %609 = vmatpush.msra.mxu0 %v429_v28  ;;  %v561_v39 = vmul.f32 %v560_v34, %v558_v23  ;;  %v568_v40 = vmul.f32 %v567_v38, %v558_v23 }
  0xf6   : > { %741 = vmatmul.msk.f32.vlgmr.msra.gmra.mxu0 %vm590_vm0, %v253_v62 }
  0xf7   : > { %v562_v41 = vadd.f32 -0.4999988, %v561_v39  ;;  %v569_v7 = vadd.f32 -0.16666654, %v568_v40 }
  0xf9   : > { %v563_v42 = vmul.f32 %v562_v41, %v558_v23  ;;  %v570_v43 = vmul.f32 %v569_v7, %v558_v23 }
  0xfb   : > { %v564_v44 = vadd.f32 1.0, %v563_v42  ;;  %v571_v46 = vadd.f32 1.0, %v570_v43 }
  0xfd   : > { %v572_v27 = vmul.f32 %v571_v46, %v556_v21  ;;  %v581_v26 = vxor.u32 2147483648, %v564_v44 }
  0xff   : > { %v578_v50 = vxor.u32 2147483648, %v572_v27  ;;  %v582_v53 = vsel %vm580_vm2, %v581_v26, %v572_v27 }
 0x101   : > { %v579_v51 = vsel %vm577_vm1, %v564_v44, %v578_v50 }
 0x102   : > { %v583_v47 = vsel %vm576_vm3, %v579_v51, %v582_v53 }
 0x103   : > { %v584_v36 = vsel %vm573_vm4, nan, %v583_v47 }
 0x104   : > { %629 = vmatpush.msra.mxu1 %v584_v36 }
 0x105   : > { %742 = vmatmul.msk.f32.vlgmr.msra.gmra.mxu1 %vm590_vm0, %v253_v62 }
 0x13b   : > { %v588_v56 = vpop.permute.xlu1 %587 }
 0x173   : > { %v611_v14 = vpop.f32.mrf.mxu0 }
 0x174   : > { %v612_v57 = vadd.f32 %v611_v14, %v588_v56 }
 0x176   : > { %634 = vst [vmem:[%s240_s7] sm:$0xff] %v612_v57 }
 0x182   : > { %v631_v11 = vpop.f32.mrf.mxu1 }
 0x183   : > { %v632_v58 = vadd.f32 %v631_v11, %v588_v56 }
 0x185   : > { %635 = vst [vmem:[%s240_s7 + $0x8] sm:$0xff] %v632_v58 }
 0x186   : > { %840 = shalt.err (!%p837_p5)
}
 0x187   : > { %749 = dma.vmem_to_hbm [thread:$0]  (%p970_p4), %s653_s12, 256, %s655_s13, %s637_s14  }
 0x188 PF: > { %p755_p6 = scmp.ge.s32.totalorder %s891_s23, 2  ;;  %s666_s27 = sand.u32 1, %s871_s18  }
 0x189   : > { %s667_s7 = scalar_lea.sflag [#allocation3], %s666_s27 }
 0x18a   : > { %p752_p7 = pnand %p755_p6, %p977_p8 }
 0x18c   : > { %p753_p9 = pneg %p752_p7 }
 0x18e   : > { %866 = dma.done.wait (%p753_p9), %s667_s7, 256  }
 0x18f   : > { %868 = vsyncadd (%p753_p9), %s667_s7, 4294967040  ;;  %s18_s23 = sadd.s32 1, %s891_s23   ;;  %s1234_s18 = smov %s875_s19 }
 0x190   : > { %p15_p10 = scmp.ge.s32.totalorder %s18_s23, 4   ;;  %s1235_s19 = smov %s879_s20 }
 0x191   : > { %s1236_s20 = smov %s983_s6  ;;  %s1237_s21 = smov %s887_s22 }
 0x192   : > { %s1238_s22 = smov %s1240_s26  ;;  %17 = sbr.rel (!%p15_p10) target bundleno = 4 (0x4), region = 75 }
 0x197   :  { %673 = vsyncpa [#allocation3], 1 }
 0x198   :  { %675 = vsyncpa [#allocation3 + $0x1], 1 }

</bundles_post_ra>
